<compile_context>
chip_gen: v5e
topology: v5e:2x2
jax: 0.10.0
libtpu: 0.0.40
codegen_flags: <defaults>
</compile_context>

<pallas_src>
import functools
import math

import jax
import jax.numpy as jnp
from jax.experimental import pallas as pl
from jax.experimental.pallas import tpu as pltpu


# --------------------------------------------------------------------------- #
# Kernel
# --------------------------------------------------------------------------- #
def patch_embed_kernel(p_ref, w_ref, pos_ref, o_ref):
    # p_ref:   (tile_m, K)      bf16 patch rows for this grid step
    # w_ref:   (K, E_pad)       bf16 projection weight (grid-invariant)
    # pos_ref: (tile_m, E_pad)  pre-tiled (pos_embed + bias) (grid-invariant)
    # o_ref:   (tile_m, E_pad)  output tile
    acc = jnp.dot(p_ref[...], w_ref[...], preferred_element_type=jnp.float32)
    o_ref[...] = (acc + pos_ref[...].astype(jnp.float32)).astype(o_ref.dtype)


# --------------------------------------------------------------------------- #
# Host-side helpers
# --------------------------------------------------------------------------- #
def extract_patches(x, patch_size):
    """NCHW -> (B*num_patches, C*P*P); patch order row-major over (ph, pw),
    per-patch feature order (C, P, P) to match the Conv2d weight layout."""
    B, C, H, W = x.shape
    P = patch_size
    nh, nw = H // P, W // P
    x = x.reshape(B, C, nh, P, nw, P)
    x = x.transpose(0, 2, 4, 1, 3, 5)          # (B, nh, nw, C, P, P)
    return x.reshape(B * nh * nw, C * P * P)


def _round_up(a, b):
    return ((a + b - 1) // b) * b


def _device_kind():
    try:
        return jax.devices()[0].device_kind.lower()
    except Exception:
        return ""


def _default_tile_rows():
    kind = _device_kind()
    if "v7" in kind:
        return 2048   # fixed grid-step overhead is a larger fraction at 3.2 TB/s
    if "v6" in kind:
        return 1024
    return 512        # v5e and older: 512 rows is at the measured knee


def _vmem_budget_bytes():
    phys = None
    try:
        phys = getattr(pltpu.get_tpu_info(), "vmem_capacity_bytes", None)
    except Exception:
        phys = None
    if not phys:
        phys = (64 << 20) if "v7" in _device_kind() else (128 << 20)
    return (int(phys) * 3) // 4          # leave headroom for internal scratch


def _plan_imgs_per_tile(B, N, K, E_pad, out_bytes, pos_bytes, tile_rows, vmem_budget):
    """Images per grid step: rows 16-aligned (bf16 sublane packing), ~tile_rows
    rows per step, >= 2 grid steps when the batch allows it (v7x megacore),
    and the working set fits the VMEM budget."""
    g = 16 // math.gcd(N, 16)                    # min images for 16-row alignment
    imgs = g * max(1, tile_rows // (g * N))
    B_min = _round_up(B, g)
    if B_min >= 2 * g:                           # keep >= 2 grid steps if possible
        imgs = min(imgs, max(g, ((B_min // 2) // g) * g))
    imgs = max(g, min(imgs, B_min))

    def vmem_bytes(ip):
        tm = ip * N
        return (tm * K * 2 * 2                   # patches bf16, double buffered
                + K * E_pad * 2 * 2              # weight bf16 (conservative 2 bufs)
                + tm * E_pad * pos_bytes * 2     # pos+bias slab (conservative 2 bufs)
                + tm * E_pad * out_bytes * 2)    # output tile, double buffered

    while imgs > g and vmem_bytes(imgs) > vmem_budget:
        imgs = max(g, ((imgs // 2) // g) * g)
    return imgs


# --------------------------------------------------------------------------- #
# Jitted implementation (prep + pallas_call + un-pad all fused in one program)
# --------------------------------------------------------------------------- #
@functools.partial(
    jax.jit,
    static_argnames=("patch_size", "imgs_per_tile", "out_dtype", "vmem_limit",
                     "opt_level"),
)
def _patch_embed_impl(x, conv_w, conv_b, pos_embed, *, patch_size, imgs_per_tile,
                      out_dtype, vmem_limit, opt_level):
    use_buffered = opt_level >= 2     # single-buffer grid-invariant operands
    use_fusion = opt_level >= 1       # fuse patch relayout into input DMA

    B, C, H, W = x.shape
    P = patch_size
    nh, nw = H // P, W // P
    N = nh * nw
    E = conv_w.shape[0]
    K = C * P * P
    E_pad = _round_up(E, 128)         # lane-dense output (no-op for 768/1024)

    B_pad = _round_up(B, imgs_per_tile)
    tile_m = imgs_per_tile * N
    M, M_pad = B * N, B_pad * N
    num_tiles = B_pad // imgs_per_tile

    # ---- operand prep (fused by jit / allow_input_fusion) --------------------
    # Cast to bf16 BEFORE the relayout so the transpose moves 2-byte elements.
    patches = extract_patches(x.astype(jnp.bfloat16), P)          # (M, K) bf16
    if M_pad > M:
        patches = jnp.pad(patches, ((0, M_pad - M), (0, 0)))

    w_flat = conv_w.reshape(E, K).T.astype(jnp.bfloat16)          # (K, E) bf16
    if E_pad > E:
        w_flat = jnp.pad(w_flat, ((0, 0), (0, E_pad - E)))

    # Fold conv bias into pos_embed, store at output precision (bf16 halves the
    # grid-invariant stream), pre-tile to one output tile.
    pos_dtype = jnp.bfloat16 if out_dtype == jnp.bfloat16 else jnp.float32
    pos_plus_b = pos_embed.reshape(N, E) + conv_b[None, :]
    if E_pad > E:
        pos_plus_b = jnp.pad(pos_plus_b, ((0, 0), (0, E_pad - E)))
    pos_tile = jnp.tile(pos_plus_b, (imgs_per_tile, 1)).astype(pos_dtype)

    # ---- block specs ----------------------------------------------------------
    patch_spec = pl.BlockSpec((tile_m, K), lambda m: (m, 0))
    if use_buffered:
        w_spec = pl.BlockSpec((K, E_pad), lambda m: (0, 0),
                              pipeline_mode=pl.Buffered(1))
        pos_spec = pl.BlockSpec((tile_m, E_pad), lambda m: (0, 0),
                                pipeline_mode=pl.Buffered(1))
    else:
        w_spec = pl.BlockSpec((K, E_pad), lambda m: (0, 0))
        pos_spec = pl.BlockSpec((tile_m, E_pad), lambda m: (0, 0))
    # Let XLA fuse the patch relayout/convert/pad into the pallas_call input.
    allow_fusion = [True, False, False] if use_fusion else None
    # TODO(synk): if allow_input_fusion is unavailable, an in-kernel NCHW->patch
    # relayout via manual DMA would remove the remaining fused-relayout pass.

    out = pl.pallas_call(
        patch_embed_kernel,
        out_shape=jax.ShapeDtypeStruct((M_pad, E_pad), out_dtype),
        grid_spec=pltpu.PrefetchScalarGridSpec(
            num_scalar_prefetch=0,
            grid=(num_tiles,),
            in_specs=[patch_spec, w_spec, pos_spec],
            out_specs=pl.BlockSpec((tile_m, E_pad), lambda m: (m, 0)),
        ),
        compiler_params=pltpu.CompilerParams(
            dimension_semantics=("parallel",),
            vmem_limit_bytes=vmem_limit,
            allow_input_fusion=allow_fusion,
        ),
    )(patches, w_flat, pos_tile)

    # Strip padding / reshape under jit so it fuses with the consumer.
    if M_pad > M or E_pad > E:
        out = out[:M, :E]
    return out.reshape(B, N, E)


# --------------------------------------------------------------------------- #
# Public wrapper
# --------------------------------------------------------------------------- #
_IMPL_LEVEL = None   # 2 = Buffered(1)+input fusion, 1 = fusion only, 0 = plain


def patch_embedding(x, conv_w, conv_b, pos_embed, patch_size, *,
                    out_dtype=jnp.bfloat16, tile_rows=None):
    """
    x:         (B, C, H, W)
    conv_w:    (E, C, P, P)   Conv2d weight (PyTorch layout)
    conv_b:    (E,)           Conv2d bias
    pos_embed: (1, N, E)
    returns:   (B, N, E) in out_dtype (bf16 default: halves the writeback of
               this memory-bound op; accumulation/epilogue stay f32).
    """
    global _IMPL_LEVEL
    B, C, H, W = x.shape
    P = patch_size
    assert H % P == 0 and W % P == 0, "image size must be divisible by patch_size"
    N = (H // P) * (W // P)
    E = conv_w.shape[0]
    K = C * P * P
    E_pad = _round_up(E, 128)

    if tile_rows is None:
        tile_rows = _default_tile_rows()
    vmem_limit = _vmem_budget_bytes()
    out_bytes = 2 if out_dtype == jnp.bfloat16 else 4
    pos_bytes = out_bytes
    imgs_per_tile = _plan_imgs_per_tile(B, N, K, E_pad, out_bytes, pos_bytes,
                                        tile_rows, vmem_limit)

    kwargs = dict(patch_size=P, imgs_per_tile=imgs_per_tile,
                  out_dtype=out_dtype, vmem_limit=vmem_limit)

    start = 2 if _IMPL_LEVEL is None else _IMPL_LEVEL
    for lvl in range(start, -1, -1):
        try:
            out = _patch_embed_impl(x, conv_w, conv_b, pos_embed,
                                    opt_level=lvl, **kwargs)
            if lvl != _IMPL_LEVEL:
                jax.block_until_ready(out)   # surface compile/runtime errors now
                _IMPL_LEVEL = lvl
            return out
        except Exception:
            # pl.Buffered / allow_input_fusion unsupported on this JAX version:
            # retry with a simpler, previously-verified pipeline configuration.
            if lvl == 0:
                raise
    raise RuntimeError("unreachable")


# --------------------------------------------------------------------------- #
# Reference + test
# --------------------------------------------------------------------------- #
def reference(x, conv_w, conv_b, pos_embed, patch_size):
    """Pure-JAX f32 reference: strided conv via patch matmul."""
    B, C, H, W = x.shape
    P = patch_size
    E = conv_w.shape[0]
    N = (H // P) * (W // P)
    patches = extract_patches(x, P).reshape(B, N, C * P * P)
    w = conv_w.reshape(E, C * P * P)
    out = jnp.einsum("bnk,ek->bne", patches, w) + conv_b[None, None, :]
    return out + pos_embed


if __name__ == "__main__":
    # Small shapes consistent with the module: image 16x16, patch 4 -> 16 patches.
    B, C, IMG, P, E = 2, 4, 16, 4, 32
    N = (IMG // P) ** 2

    key = jax.random.PRNGKey(0)
    kx, kw, kb, kp = jax.random.split(key, 4)
    x = jax.random.normal(kx, (B, C, IMG, IMG), dtype=jnp.float32)
    conv_w = jax.random.normal(kw, (E, C, P, P), dtype=jnp.float32) * 0.02
    conv_b = jax.random.normal(kb, (E,), dtype=jnp.float32) * 0.02
    pos_embed = jax.random.normal(kp, (1, N, E), dtype=jnp.float32)

    out = patch_embedding(x, conv_w, conv_b, pos_embed, P)
    out = jax.block_until_ready(out)

    ref = reference(x, conv_w, conv_b, pos_embed, P)
    assert out.shape == (B, N, E), out.shape
    # bf16 matmul operands + bf16 output (f32 accumulation) vs f32 reference.
    assert jnp.allclose(out.astype(jnp.float32), ref, atol=2e-2, rtol=2e-2), \
        "mismatch vs reference"

    print("KERNEL_OK")
</pallas_src>

<mosaic_0001>
module attributes {stable_mosaic.version = 11 : i64} {
  func.func @patch_embed_kernel(%arg0: i32, %arg1: memref<16x64xbf16, #tpu.memory_space<vmem>>, %arg2: memref<64x128xbf16, #tpu.memory_space<vmem>>, %arg3: memref<16x128xbf16, #tpu.memory_space<vmem>>, %arg4: memref<16x128xbf16, #tpu.memory_space<vmem>>) attributes {dimension_semantics = [#tpu.dimension_semantics<parallel>], iteration_bounds = array<i64: 2>, scalar_prefetch = 0 : i64, scratch_operands = 0 : i64, tpu.core_type = #tpu.core_type<tc>, window_params = [{transform_indices = @transform_0, window_bounds = array<i64: 16, 64>}, {pipeline_mode = #tpu.pipeline_mode<synchronous>, transform_indices = @transform_1, window_bounds = array<i64: 64, 128>}, {pipeline_mode = #tpu.pipeline_mode<synchronous>, transform_indices = @transform_2, window_bounds = array<i64: 16, 128>}, {transform_indices = @transform_3, window_bounds = array<i64: 16, 128>}]} {
    %c0 = arith.constant 0 : index
    %c0_0 = arith.constant 0 : index
    %0 = vector.load %arg1[%c0, %c0_0] : memref<16x64xbf16, #tpu.memory_space<vmem>>, vector<16x64xbf16>
    %c0_1 = arith.constant 0 : index
    %c0_2 = arith.constant 0 : index
    %1 = vector.load %arg2[%c0_1, %c0_2] : memref<64x128xbf16, #tpu.memory_space<vmem>>, vector<64x128xbf16>
    %cst = arith.constant dense<0.000000e+00> : vector<16x128xf32>
    %2 = tpu.matmul %0, %1, %cst {dimension_numbers = #tpu.dot_dimension_numbers<[1], [0], [0], [1], [0, 0, 1, 1], [], []>} : vector<16x64xbf16>, vector<64x128xbf16>, vector<16x128xf32> -> vector<16x128xf32>
    %c0_3 = arith.constant 0 : index
    %c0_4 = arith.constant 0 : index
    %3 = vector.load %arg3[%c0_3, %c0_4] : memref<16x128xbf16, #tpu.memory_space<vmem>>, vector<16x128xbf16>
    %4 = arith.extf %3 : vector<16x128xbf16> to vector<16x128xf32>
    %5 = arith.addf %2, %4 : vector<16x128xf32>
    %6 = arith.truncf %5 : vector<16x128xf32> to vector<16x128xbf16>
    %c0_5 = arith.constant 0 : index
    %c0_6 = arith.constant 0 : index
    %7 = vector.load %arg4[%c0_5, %c0_6] : memref<16x128xbf16, #tpu.memory_space<vmem>>, vector<16x128xbf16>
    tpu.vector_store %arg4[%c0_5, %c0_6], %6 {strides = array<i32>} : memref<16x128xbf16, #tpu.memory_space<vmem>>, vector<16x128xbf16>,
    return
  }
  func.func @transform_0(%arg0: i32) -> (i32, i32) {
    %c0_i32 = arith.constant 0 : i32
    %c0_i32_0 = arith.constant 0 : i32
    return %arg0, %c0_i32 : i32, i32
  }
  func.func @transform_1(%arg0: i32) -> (i32, i32) {
    %c0_i32 = arith.constant 0 : i32
    %c0_i32_0 = arith.constant 0 : i32
    %c0_i32_1 = arith.constant 0 : i32
    return %c0_i32, %c0_i32_0 : i32, i32
  }
  func.func @transform_2(%arg0: i32) -> (i32, i32) {
    %c0_i32 = arith.constant 0 : i32
    %c0_i32_0 = arith.constant 0 : i32
    %c0_i32_1 = arith.constant 0 : i32
    return %c0_i32, %c0_i32_0 : i32, i32
  }
  func.func @transform_3(%arg0: i32) -> (i32, i32) {
    %c0_i32 = arith.constant 0 : i32
    %c0_i32_0 = arith.constant 0 : i32
    return %arg0, %c0_i32 : i32, i32
  }
}

module attributes {stable_mosaic.version = 11 : i64} {
  func.func @patch_embed_kernel(%arg0: i32, %arg1: memref<16x64xbf16, #tpu.memory_space<vmem>>, %arg2: memref<64x128xbf16, #tpu.memory_space<vmem>>, %arg3: memref<16x128xbf16, #tpu.memory_space<vmem>>, %arg4: memref<16x128xbf16, #tpu.memory_space<vmem>>) attributes {dimension_semantics = [#tpu.dimension_semantics<parallel>], iteration_bounds = array<i64: 2>, scalar_prefetch = 0 : i64, scratch_operands = 0 : i64, tpu.core_type = #tpu.core_type<tc>, window_params = [{transform_indices = @transform_0, window_bounds = array<i64: 16, 64>}, {pipeline_mode = #tpu.pipeline_mode<synchronous>, transform_indices = @transform_1, window_bounds = array<i64: 64, 128>}, {pipeline_mode = #tpu.pipeline_mode<synchronous>, transform_indices = @transform_2, window_bounds = array<i64: 16, 128>}, {transform_indices = @transform_3, window_bounds = array<i64: 16, 128>}]} {
    %c0 = arith.constant 0 : index
    %c0_0 = arith.constant 0 : index
    %0 = vector.load %arg1[%c0, %c0_0] : memref<16x64xbf16, #tpu.memory_space<vmem>>, vector<16x64xbf16>
    %c0_1 = arith.constant 0 : index
    %c0_2 = arith.constant 0 : index
    %1 = vector.load %arg2[%c0_1, %c0_2] : memref<64x128xbf16, #tpu.memory_space<vmem>>, vector<64x128xbf16>
    %cst = arith.constant dense<0.000000e+00> : vector<16x128xf32>
    %2 = tpu.matmul %0, %1, %cst {dimension_numbers = #tpu.dot_dimension_numbers<[1], [0], [0], [1], [0, 0, 1, 1], [], []>} : vector<16x64xbf16>, vector<64x128xbf16>, vector<16x128xf32> -> vector<16x128xf32>
    %c0_3 = arith.constant 0 : index
    %c0_4 = arith.constant 0 : index
    %3 = vector.load %arg3[%c0_3, %c0_4] : memref<16x128xbf16, #tpu.memory_space<vmem>>, vector<16x128xbf16>
    %4 = arith.extf %3 : vector<16x128xbf16> to vector<16x128xf32>
    %5 = arith.addf %2, %4 : vector<16x128xf32>
    %6 = arith.truncf %5 : vector<16x128xf32> to vector<16x128xbf16>
    %c0_5 = arith.constant 0 : index
    %c0_6 = arith.constant 0 : index
    %7 = vector.load %arg4[%c0_5, %c0_6] : memref<16x128xbf16, #tpu.memory_space<vmem>>, vector<16x128xbf16>
    tpu.vector_store %arg4[%c0_5, %c0_6], %6 {strides = array<i32>} : memref<16x128xbf16, #tpu.memory_space<vmem>>, vector<16x128xbf16>,
    return
  }
  func.func @transform_0(%arg0: i32) -> (i32, i32) {
    %c0_i32 = arith.constant 0 : i32
    %c0_i32_0 = arith.constant 0 : i32
    return %arg0, %c0_i32 : i32, i32
  }
  func.func @transform_1(%arg0: i32) -> (i32, i32) {
    %c0_i32 = arith.constant 0 : i32
    %c0_i32_0 = arith.constant 0 : i32
    %c0_i32_1 = arith.constant 0 : i32
    return %c0_i32, %c0_i32_0 : i32, i32
  }
  func.func @transform_2(%arg0: i32) -> (i32, i32) {
    %c0_i32 = arith.constant 0 : i32
    %c0_i32_0 = arith.constant 0 : i32
    %c0_i32_1 = arith.constant 0 : i32
    return %c0_i32, %c0_i32_0 : i32, i32
  }
  func.func @transform_3(%arg0: i32) -> (i32, i32) {
    %c0_i32 = arith.constant 0 : i32
    %c0_i32_0 = arith.constant 0 : i32
    return %arg0, %c0_i32 : i32, i32
  }
}

module attributes {stable_mosaic.version = 11 : i64} {
  func.func @patch_embed_kernel(%arg0: i32, %arg1: memref<16x64xbf16, #tpu.memory_space<vmem>>, %arg2: memref<64x128xbf16, #tpu.memory_space<vmem>>, %arg3: memref<16x128xbf16, #tpu.memory_space<vmem>>, %arg4: memref<16x128xbf16, #tpu.memory_space<vmem>>) attributes {dimension_semantics = [#tpu.dimension_semantics<parallel>], iteration_bounds = array<i64: 2>, scalar_prefetch = 0 : i64, scratch_operands = 0 : i64, tpu.core_type = #tpu.core_type<tc>, window_params = [{transform_indices = @transform_0, window_bounds = array<i64: 16, 64>}, {pipeline_mode = #tpu.pipeline_mode<synchronous>, transform_indices = @transform_1, window_bounds = array<i64: 64, 128>}, {pipeline_mode = #tpu.pipeline_mode<synchronous>, transform_indices = @transform_2, window_bounds = array<i64: 16, 128>}, {transform_indices = @transform_3, window_bounds = array<i64: 16, 128>}]} {
    %c0 = arith.constant 0 : index
    %c0_0 = arith.constant 0 : index
    %0 = vector.load %arg1[%c0, %c0_0] : memref<16x64xbf16, #tpu.memory_space<vmem>>, vector<16x64xbf16>
    %c0_1 = arith.constant 0 : index
    %c0_2 = arith.constant 0 : index
    %1 = vector.load %arg2[%c0_1, %c0_2] : memref<64x128xbf16, #tpu.memory_space<vmem>>, vector<64x128xbf16>
    %cst = arith.constant dense<0.000000e+00> : vector<16x128xf32>
    %2 = tpu.matmul %0, %1, %cst {dimension_numbers = #tpu.dot_dimension_numbers<[1], [0], [0], [1], [0, 0, 1, 1], [], []>} : vector<16x64xbf16>, vector<64x128xbf16>, vector<16x128xf32> -> vector<16x128xf32>
    %c0_3 = arith.constant 0 : index
    %c0_4 = arith.constant 0 : index
    %3 = vector.load %arg3[%c0_3, %c0_4] : memref<16x128xbf16, #tpu.memory_space<vmem>>, vector<16x128xbf16>
    %4 = arith.extf %3 : vector<16x128xbf16> to vector<16x128xf32>
    %5 = arith.addf %2, %4 : vector<16x128xf32>
    %6 = arith.truncf %5 : vector<16x128xf32> to vector<16x128xbf16>
    %c0_5 = arith.constant 0 : index
    %c0_6 = arith.constant 0 : index
    %7 = vector.load %arg4[%c0_5, %c0_6] : memref<16x128xbf16, #tpu.memory_space<vmem>>, vector<16x128xbf16>
    tpu.vector_store %arg4[%c0_5, %c0_6], %6 {strides = array<i32>} : memref<16x128xbf16, #tpu.memory_space<vmem>>, vector<16x128xbf16>,
    return
  }
  func.func @transform_0(%arg0: i32) -> (i32, i32) {
    %c0_i32 = arith.constant 0 : i32
    %c0_i32_0 = arith.constant 0 : i32
    return %arg0, %c0_i32 : i32, i32
  }
  func.func @transform_1(%arg0: i32) -> (i32, i32) {
    %c0_i32 = arith.constant 0 : i32
    %c0_i32_0 = arith.constant 0 : i32
    %c0_i32_1 = arith.constant 0 : i32
    return %c0_i32, %c0_i32_0 : i32, i32
  }
  func.func @transform_2(%arg0: i32) -> (i32, i32) {
    %c0_i32 = arith.constant 0 : i32
    %c0_i32_0 = arith.constant 0 : i32
    %c0_i32_1 = arith.constant 0 : i32
    return %c0_i32, %c0_i32_0 : i32, i32
  }
  func.func @transform_3(%arg0: i32) -> (i32, i32) {
    %c0_i32 = arith.constant 0 : i32
    %c0_i32_0 = arith.constant 0 : i32
    return %arg0, %c0_i32 : i32, i32
  }
}

</mosaic_0001>

<bundles_post_ra>
// kernel: _patch_embed_impl.1
= control target key start
LH: loop header
LB: loop body
LE: loop exit
PB: predicated region body
PF: predicated region fallthrough
CT: control target
= control target key end

     0   :  { %8 = vsyncpa [#allocation3], 0  ;;  %s593_s0 = inlined_call_operand.vmem [shape: bf16[32,64], index: 0, kind: input, shape index: {}]   ;;  %s594_s1 = inlined_call_operand.vmem [shape: bf16[64,128], index: 1, kind: input, shape index: {}]   ;;  %s595_s2 = inlined_call_operand.vmem [shape: bf16[16,128], index: 2, kind: input, shape index: {}]   ;;  %s596_s3 = inlined_call_operand.hbm [shape: bf16[32,128], index: 3, kind: output, shape index: {}]  }
   0x1   :  { %10 = vsyncpa [#allocation3 + $0x1], 0  ;;  %s491_s12 = smov 0   ;;  %s493_s13 = smov 0  }
   0x2   :  { %s495_s14 = smov 0   ;;  %s497_s15 = smov 0  }
   0x3 LB: > { %s512_s16 = sadd.s32 4294967295, %s467_s15   ;;  %s316_s17 = sadd.s32 4294967294, %s467_s15   ;;  %s467_s15 = sphi %s497_s15, %s602_s15   ;;  %s463_s14 = sphi %s495_s14, %s601_s14   ;;  %s459_s13 = sphi %s493_s13, %s600_s13   ;;  %s455_s12 = sphi %s491_s12, %s599_s12  }
   0x4   : > { %s516_s18 = sadd.s32 1, %s467_s15   ;;  %s91_s19 = sadd.s32 1, %s463_s14 }
   0x5   : > { %s88_s20 = ssub.s32 %s467_s15, %s516_s18  ;;  %p101_p0 = scmp.ne.s32.totalorder %s463_s14, %s459_s13 }
   0x6   : > { %p89_p1 = scmp.eq.s32.totalorder %s88_s20, 0  ;;  %p102_p2 = scmp.eq.s32.totalorder %s512_s16, 1 }
   0x7   : > { %p107_p3 = scmp.ne.s32.totalorder %s459_s13, %s455_s12  ;;  %p108_p4 = scmp.eq.s32.totalorder %s316_s17, 1 }
   0x8   : > { %s527_s21 = scalar_select %p89_p1, %s463_s14, %s91_s19  }
   0x9   : > { %p529_p5 = por %p102_p2, %p101_p0  ;;  %p533_p6 = por %p108_p4, %p107_p3 }
   0xa   : > { %p319_p7 = scmp.ge.s32.totalorder %s467_s15, 1  ;;  %p141_p8 = scmp.lt.s32.totalorder %s467_s15, 3 }
   0xc   : > { %p142_p9 = pnand %p319_p7, %p141_p8 }
   0xd   : > { %s321_s26 = sshll.u32 (!%p142_p9), %s512_s16, 1  ;;  %s162_s10 = sand.u32 (!%p142_p9), 1, %s459_s13  }
   0xe   : > { %145 = sbr.rel (%p142_p9) target bundleno = 177 (0xb1), region = 32  ;;  %p166_p10 = scmp.lt.s32.totalorder (!%p142_p9), %s321_s26, 3 }
   0xf   : > { %s320_s11 = sshll.u32 (!%p142_p9), %s162_s10, 3  ;;  %s354_s17 = sshll.u32 (!%p142_p9), %s512_s16, 3 }
  0x10   : > { %s164_s27 = scalar_lea.vmem (!%p142_p9), [#allocation2], %s320_s11  ;;  %s239_s16 = scalar_lea.sflag (!%p142_p9), [#allocation3], %s162_s10 }
  0x11   : > { %s563_s28 = sshll.u32 (!%p142_p9), %s164_s27, 4  ;;  %s425_s7 = scalar_lea.hbm (!%p142_p9), %s596_s3, 16  ;;  %s252_s28 = int_to_ptr.vmem [resolvable:$true] %s563_s28 }
  0x13   : > { %v353_v0 = vld [vmem:[%s594_s1 + $0x18] sm:$0xff]  ;;  %v352_v1 = vld [vmem:[%s594_s1 + $0x10] sm:$0xff]  ;;  %s604_s26 = smov (!%p166_p10, %s321_s26), 3  ;;  %v351_v2 = vld [vmem:[%s594_s1 + $0x8] sm:$0xff]  ;;  %vm216_vm0 = vcmask 523264  }
  0x14   : > { %224 = vmatpush.bf16.msra.mxu0 %v353_v0  ;;  %s322_s4 = sshll.u32 %s604_s26, 2  ;;  %v350_v3 = vld [vmem:[%s594_s1] sm:$0xff]  ;;  %s250_s26 = scalar_lea.hbm %s596_s3, %s354_s17 }
  0x15   : > { %s169_s9 = scalar_lea.vmem %s593_s0, %s322_s4  ;;  %v356_v6 = vld [vmem:[%s595_s2] sm:$0xff]   ;;  %s253_s29 = sshll.u32 %s250_s26, 4  ;;  %s254_s29 = int_to_ptr.hbm [resolvable:$true] %s253_s29 }
  0x16   : > { %v349_v4 = vld [vmem:[%s169_s9] sm:$0xff]  ;;  %v357_v7 = vunpack.c.l.bf16 %v356_v6  ;;  %v358_v8 = vunpack.c.h.bf16 %v356_v6  ;;  %s419_s30 = sshra.s32 %s254_s29, 4  ;;  %s420_s30 = int_to_ptr.hbm [resolvable:$true] %s419_s30 }
  0x17   : > { %s421_s4 = scalar_lea.hbm %s420_s30, 8  ;;  %p426_p0 = scmp.lt.s32.totalorder %s420_s30, %s596_s3 }
  0x18   : > { %225 = vmatpush.bf16.msra.mxu0 %v352_v1  ;;  %p422_p11 = scmp.ne.s32.totalorder %s420_s30, %s421_s4  ;;  %p427_p1 = scmp.lt.s32.totalorder %s425_s7, %s421_s4 }
  0x1a   : > { %p423_p12 = pnand %p422_p11, %p529_p5  ;;  %p428_p2 = por %p427_p1, %p426_p0 }
  0x1c   : > { %226 = vmatpush.bf16.msra.mxu0 %v351_v2  ;;  %p424_p13 = pneg %p423_p12 }
  0x1e   : > { %p429_p3 = pnand %p428_p2, %p424_p13 }
  0x20   : > { %227 = vmatpush.bf16.msra.mxu0 %v350_v3 }
  0x23   : > { %343 = vmatmul.msk.bf16.vlgmr.msra.gmra.mxu0 %vm216_vm0, %v349_v4 }
  0xa0   : > { %v229_v5 = vpop.f32.mrf.mxu0 }
  0xa1   : > { %v230_v10 = vadd.f32 %v357_v7, %v229_v5 }
  0xa8   : > { %v231_v9 = vpop.f32.mrf.mxu0 }
  0xa9   : > { %v232_v11 = vadd.f32 %v358_v8, %v231_v9 }
  0xab   : > { %v362_v12 = vpack.c.bf16 %v232_v11, %v230_v10 }
  0xad   : > { %363 = vst [vmem:[%s164_s27] sm:$0xff] %v362_v12  }
  0xae   : > { %432 = shalt.err (!%p429_p3)
}
  0xaf   : > { %s469_s10 = smov 64   ;;  %s470_s11 = smov 4  }
  0xb0   : > { %364 = dma.vmem_to_hbm [thread:$0]  (%p529_p5), %s252_s28, 128, %s254_s29, %s239_s16, %s469_s10, %s469_s10, %s470_s11  }
  0xb1 PF: > { %p370_p4 = scmp.ge.s32.totalorder %s467_s15, 2  ;;  %s268_s17 = sand.u32 1, %s455_s12  }
  0xb2   : > { %s269_s19 = scalar_lea.sflag [#allocation3], %s268_s17 }
  0xb3   : > { %p367_p7 = pnand %p370_p4, %p533_p6 }
  0xb5   : > { %p368_p8 = pneg %p367_p7 }
  0xb7   : > { %450 = dma.done.wait (%p368_p8), %s269_s19, 128  }
  0xb8   : > { %452 = vsyncadd (%p368_p8), %s269_s19, 4294967168  ;;  %p13_p9 = scmp.ge.s32.totalorder %s516_s18, 4   ;;  %s599_s12 = smov %s459_s13 }
  0xb9   : > { %s600_s13 = smov %s463_s14  ;;  %s601_s14 = smov %s527_s21 }
  0xba   : > { %s602_s15 = smov %s516_s18  ;;  %15 = sbr.rel (!%p13_p9) target bundleno = 3 (0x3), region = 67 }
  0xbf   :  { %275 = vsyncpa [#allocation3], 1 }
  0xc0   :  { %277 = vsyncpa [#allocation3 + $0x1], 1 }

// kernel: _patch_embed_impl.1
= control target key start
LH: loop header
LB: loop body
LE: loop exit
PB: predicated region body
PF: predicated region fallthrough
CT: control target
= control target key end

     0   :  { %8 = vsyncpa [#allocation3], 0  ;;  %s593_s0 = inlined_call_operand.vmem [shape: bf16[32,64], index: 0, kind: input, shape index: {}]   ;;  %s594_s1 = inlined_call_operand.vmem [shape: bf16[64,128], index: 1, kind: input, shape index: {}]   ;;  %s595_s2 = inlined_call_operand.vmem [shape: bf16[16,128], index: 2, kind: input, shape index: {}]   ;;  %s596_s3 = inlined_call_operand.hbm [shape: bf16[32,128], index: 3, kind: output, shape index: {}]  }
   0x1   :  { %10 = vsyncpa [#allocation3 + $0x1], 0  ;;  %s491_s12 = smov 0   ;;  %s493_s13 = smov 0  }
   0x2   :  { %s495_s14 = smov 0   ;;  %s497_s15 = smov 0  }
   0x3 LB: > { %s512_s16 = sadd.s32 4294967295, %s467_s15   ;;  %s316_s17 = sadd.s32 4294967294, %s467_s15   ;;  %s467_s15 = sphi %s497_s15, %s602_s15   ;;  %s463_s14 = sphi %s495_s14, %s601_s14   ;;  %s459_s13 = sphi %s493_s13, %s600_s13   ;;  %s455_s12 = sphi %s491_s12, %s599_s12  }
   0x4   : > { %s516_s18 = sadd.s32 1, %s467_s15   ;;  %s91_s19 = sadd.s32 1, %s463_s14 }
   0x5   : > { %s88_s20 = ssub.s32 %s467_s15, %s516_s18  ;;  %p101_p0 = scmp.ne.s32.totalorder %s463_s14, %s459_s13 }
   0x6   : > { %p89_p1 = scmp.eq.s32.totalorder %s88_s20, 0  ;;  %p102_p2 = scmp.eq.s32.totalorder %s512_s16, 1 }
   0x7   : > { %p107_p3 = scmp.ne.s32.totalorder %s459_s13, %s455_s12  ;;  %p108_p4 = scmp.eq.s32.totalorder %s316_s17, 1 }
   0x8   : > { %s527_s21 = scalar_select %p89_p1, %s463_s14, %s91_s19  }
   0x9   : > { %p529_p5 = por %p102_p2, %p101_p0  ;;  %p533_p6 = por %p108_p4, %p107_p3 }
   0xa   : > { %p319_p7 = scmp.ge.s32.totalorder %s467_s15, 1  ;;  %p141_p8 = scmp.lt.s32.totalorder %s467_s15, 3 }
   0xc   : > { %p142_p9 = pnand %p319_p7, %p141_p8 }
   0xd   : > { %s321_s26 = sshll.u32 (!%p142_p9), %s512_s16, 1  ;;  %s162_s10 = sand.u32 (!%p142_p9), 1, %s459_s13  }
   0xe   : > { %145 = sbr.rel (%p142_p9) target bundleno = 177 (0xb1), region = 32  ;;  %p166_p10 = scmp.lt.s32.totalorder (!%p142_p9), %s321_s26, 3 }
   0xf   : > { %s320_s11 = sshll.u32 (!%p142_p9), %s162_s10, 3  ;;  %s354_s17 = sshll.u32 (!%p142_p9), %s512_s16, 3 }
  0x10   : > { %s164_s27 = scalar_lea.vmem (!%p142_p9), [#allocation2], %s320_s11  ;;  %s239_s16 = scalar_lea.sflag (!%p142_p9), [#allocation3], %s162_s10 }
  0x11   : > { %s563_s28 = sshll.u32 (!%p142_p9), %s164_s27, 4  ;;  %s425_s7 = scalar_lea.hbm (!%p142_p9), %s596_s3, 16  ;;  %s252_s28 = int_to_ptr.vmem [resolvable:$true] %s563_s28 }
  0x13   : > { %v353_v0 = vld [vmem:[%s594_s1 + $0x18] sm:$0xff]  ;;  %v352_v1 = vld [vmem:[%s594_s1 + $0x10] sm:$0xff]  ;;  %s604_s26 = smov (!%p166_p10, %s321_s26), 3  ;;  %v351_v2 = vld [vmem:[%s594_s1 + $0x8] sm:$0xff]  ;;  %vm216_vm0 = vcmask 523264  }
  0x14   : > { %224 = vmatpush.bf16.msra.mxu0 %v353_v0  ;;  %s322_s4 = sshll.u32 %s604_s26, 2  ;;  %v350_v3 = vld [vmem:[%s594_s1] sm:$0xff]  ;;  %s250_s26 = scalar_lea.hbm %s596_s3, %s354_s17 }
  0x15   : > { %s169_s9 = scalar_lea.vmem %s593_s0, %s322_s4  ;;  %v356_v6 = vld [vmem:[%s595_s2] sm:$0xff]   ;;  %s253_s29 = sshll.u32 %s250_s26, 4  ;;  %s254_s29 = int_to_ptr.hbm [resolvable:$true] %s253_s29 }
  0x16   : > { %v349_v4 = vld [vmem:[%s169_s9] sm:$0xff]  ;;  %v357_v7 = vunpack.c.l.bf16 %v356_v6  ;;  %v358_v8 = vunpack.c.h.bf16 %v356_v6  ;;  %s419_s30 = sshra.s32 %s254_s29, 4  ;;  %s420_s30 = int_to_ptr.hbm [resolvable:$true] %s419_s30 }
  0x17   : > { %s421_s4 = scalar_lea.hbm %s420_s30, 8  ;;  %p426_p0 = scmp.lt.s32.totalorder %s420_s30, %s596_s3 }
  0x18   : > { %225 = vmatpush.bf16.msra.mxu0 %v352_v1  ;;  %p422_p11 = scmp.ne.s32.totalorder %s420_s30, %s421_s4  ;;  %p427_p1 = scmp.lt.s32.totalorder %s425_s7, %s421_s4 }
  0x1a   : > { %p423_p12 = pnand %p422_p11, %p529_p5  ;;  %p428_p2 = por %p427_p1, %p426_p0 }
  0x1c   : > { %226 = vmatpush.bf16.msra.mxu0 %v351_v2  ;;  %p424_p13 = pneg %p423_p12 }
  0x1e   : > { %p429_p3 = pnand %p428_p2, %p424_p13 }
  0x20   : > { %227 = vmatpush.bf16.msra.mxu0 %v350_v3 }
  0x23   : > { %343 = vmatmul.msk.bf16.vlgmr.msra.gmra.mxu0 %vm216_vm0, %v349_v4 }
  0xa0   : > { %v229_v5 = vpop.f32.mrf.mxu0 }
  0xa1   : > { %v230_v10 = vadd.f32 %v357_v7, %v229_v5 }
  0xa8   : > { %v231_v9 = vpop.f32.mrf.mxu0 }
  0xa9   : > { %v232_v11 = vadd.f32 %v358_v8, %v231_v9 }
  0xab   : > { %v362_v12 = vpack.c.bf16 %v232_v11, %v230_v10 }
  0xad   : > { %363 = vst [vmem:[%s164_s27] sm:$0xff] %v362_v12  }
  0xae   : > { %432 = shalt.err (!%p429_p3)
}
  0xaf   : > { %s469_s10 = smov 64   ;;  %s470_s11 = smov 4  }
  0xb0   : > { %364 = dma.vmem_to_hbm [thread:$0]  (%p529_p5), %s252_s28, 128, %s254_s29, %s239_s16, %s469_s10, %s469_s10, %s470_s11  }
  0xb1 PF: > { %p370_p4 = scmp.ge.s32.totalorder %s467_s15, 2  ;;  %s268_s17 = sand.u32 1, %s455_s12  }
  0xb2   : > { %s269_s19 = scalar_lea.sflag [#allocation3], %s268_s17 }
  0xb3   : > { %p367_p7 = pnand %p370_p4, %p533_p6 }
  0xb5   : > { %p368_p8 = pneg %p367_p7 }
  0xb7   : > { %450 = dma.done.wait (%p368_p8), %s269_s19, 128  }
  0xb8   : > { %452 = vsyncadd (%p368_p8), %s269_s19, 4294967168  ;;  %p13_p9 = scmp.ge.s32.totalorder %s516_s18, 4   ;;  %s599_s12 = smov %s459_s13 }
  0xb9   : > { %s600_s13 = smov %s463_s14  ;;  %s601_s14 = smov %s527_s21 }
  0xba   : > { %s602_s15 = smov %s516_s18  ;;  %15 = sbr.rel (!%p13_p9) target bundleno = 3 (0x3), region = 67 }
  0xbf   :  { %275 = vsyncpa [#allocation3], 1 }
  0xc0   :  { %277 = vsyncpa [#allocation3 + $0x1], 1 }

// kernel: _patch_embed_impl.1
= control target key start
LH: loop header
LB: loop body
LE: loop exit
PB: predicated region body
PF: predicated region fallthrough
CT: control target
= control target key end

     0   :  { %8 = vsyncpa [#allocation3], 0  ;;  %s593_s0 = inlined_call_operand.vmem [shape: bf16[32,64], index: 0, kind: input, shape index: {}]   ;;  %s594_s1 = inlined_call_operand.vmem [shape: bf16[64,128], index: 1, kind: input, shape index: {}]   ;;  %s595_s2 = inlined_call_operand.vmem [shape: bf16[16,128], index: 2, kind: input, shape index: {}]   ;;  %s596_s3 = inlined_call_operand.hbm [shape: bf16[32,128], index: 3, kind: output, shape index: {}]  }
   0x1   :  { %10 = vsyncpa [#allocation3 + $0x1], 0  ;;  %s491_s12 = smov 0   ;;  %s493_s13 = smov 0  }
   0x2   :  { %s495_s14 = smov 0   ;;  %s497_s15 = smov 0  }
   0x3 LB: > { %s512_s16 = sadd.s32 4294967295, %s467_s15   ;;  %s316_s17 = sadd.s32 4294967294, %s467_s15   ;;  %s467_s15 = sphi %s497_s15, %s602_s15   ;;  %s463_s14 = sphi %s495_s14, %s601_s14   ;;  %s459_s13 = sphi %s493_s13, %s600_s13   ;;  %s455_s12 = sphi %s491_s12, %s599_s12  }
   0x4   : > { %s516_s18 = sadd.s32 1, %s467_s15   ;;  %s91_s19 = sadd.s32 1, %s463_s14 }
   0x5   : > { %s88_s20 = ssub.s32 %s467_s15, %s516_s18  ;;  %p101_p0 = scmp.ne.s32.totalorder %s463_s14, %s459_s13 }
   0x6   : > { %p89_p1 = scmp.eq.s32.totalorder %s88_s20, 0  ;;  %p102_p2 = scmp.eq.s32.totalorder %s512_s16, 1 }
   0x7   : > { %p107_p3 = scmp.ne.s32.totalorder %s459_s13, %s455_s12  ;;  %p108_p4 = scmp.eq.s32.totalorder %s316_s17, 1 }
   0x8   : > { %s527_s21 = scalar_select %p89_p1, %s463_s14, %s91_s19  }
   0x9   : > { %p529_p5 = por %p102_p2, %p101_p0  ;;  %p533_p6 = por %p108_p4, %p107_p3 }
   0xa   : > { %p319_p7 = scmp.ge.s32.totalorder %s467_s15, 1  ;;  %p141_p8 = scmp.lt.s32.totalorder %s467_s15, 3 }
   0xc   : > { %p142_p9 = pnand %p319_p7, %p141_p8 }
   0xd   : > { %s321_s26 = sshll.u32 (!%p142_p9), %s512_s16, 1  ;;  %s162_s10 = sand.u32 (!%p142_p9), 1, %s459_s13  }
   0xe   : > { %145 = sbr.rel (%p142_p9) target bundleno = 177 (0xb1), region = 32  ;;  %p166_p10 = scmp.lt.s32.totalorder (!%p142_p9), %s321_s26, 3 }
   0xf   : > { %s320_s11 = sshll.u32 (!%p142_p9), %s162_s10, 3  ;;  %s354_s17 = sshll.u32 (!%p142_p9), %s512_s16, 3 }
  0x10   : > { %s164_s27 = scalar_lea.vmem (!%p142_p9), [#allocation2], %s320_s11  ;;  %s239_s16 = scalar_lea.sflag (!%p142_p9), [#allocation3], %s162_s10 }
  0x11   : > { %s563_s28 = sshll.u32 (!%p142_p9), %s164_s27, 4  ;;  %s425_s7 = scalar_lea.hbm (!%p142_p9), %s596_s3, 16  ;;  %s252_s28 = int_to_ptr.vmem [resolvable:$true] %s563_s28 }
  0x13   : > { %v353_v0 = vld [vmem:[%s594_s1 + $0x18] sm:$0xff]  ;;  %v352_v1 = vld [vmem:[%s594_s1 + $0x10] sm:$0xff]  ;;  %s604_s26 = smov (!%p166_p10, %s321_s26), 3  ;;  %v351_v2 = vld [vmem:[%s594_s1 + $0x8] sm:$0xff]  ;;  %vm216_vm0 = vcmask 523264  }
  0x14   : > { %224 = vmatpush.bf16.msra.mxu0 %v353_v0  ;;  %s322_s4 = sshll.u32 %s604_s26, 2  ;;  %v350_v3 = vld [vmem:[%s594_s1] sm:$0xff]  ;;  %s250_s26 = scalar_lea.hbm %s596_s3, %s354_s17 }
  0x15   : > { %s169_s9 = scalar_lea.vmem %s593_s0, %s322_s4  ;;  %v356_v6 = vld [vmem:[%s595_s2] sm:$0xff]   ;;  %s253_s29 = sshll.u32 %s250_s26, 4  ;;  %s254_s29 = int_to_ptr.hbm [resolvable:$true] %s253_s29 }
  0x16   : > { %v349_v4 = vld [vmem:[%s169_s9] sm:$0xff]  ;;  %v357_v7 = vunpack.c.l.bf16 %v356_v6  ;;  %v358_v8 = vunpack.c.h.bf16 %v356_v6  ;;  %s419_s30 = sshra.s32 %s254_s29, 4  ;;  %s420_s30 = int_to_ptr.hbm [resolvable:$true] %s419_s30 }
  0x17   : > { %s421_s4 = scalar_lea.hbm %s420_s30, 8  ;;  %p426_p0 = scmp.lt.s32.totalorder %s420_s30, %s596_s3 }
  0x18   : > { %225 = vmatpush.bf16.msra.mxu0 %v352_v1  ;;  %p422_p11 = scmp.ne.s32.totalorder %s420_s30, %s421_s4  ;;  %p427_p1 = scmp.lt.s32.totalorder %s425_s7, %s421_s4 }
  0x1a   : > { %p423_p12 = pnand %p422_p11, %p529_p5  ;;  %p428_p2 = por %p427_p1, %p426_p0 }
  0x1c   : > { %226 = vmatpush.bf16.msra.mxu0 %v351_v2  ;;  %p424_p13 = pneg %p423_p12 }
  0x1e   : > { %p429_p3 = pnand %p428_p2, %p424_p13 }
  0x20   : > { %227 = vmatpush.bf16.msra.mxu0 %v350_v3 }
  0x23   : > { %343 = vmatmul.msk.bf16.vlgmr.msra.gmra.mxu0 %vm216_vm0, %v349_v4 }
  0xa0   : > { %v229_v5 = vpop.f32.mrf.mxu0 }
  0xa1   : > { %v230_v10 = vadd.f32 %v357_v7, %v229_v5 }
  0xa8   : > { %v231_v9 = vpop.f32.mrf.mxu0 }
  0xa9   : > { %v232_v11 = vadd.f32 %v358_v8, %v231_v9 }
  0xab   : > { %v362_v12 = vpack.c.bf16 %v232_v11, %v230_v10 }
  0xad   : > { %363 = vst [vmem:[%s164_s27] sm:$0xff] %v362_v12  }
  0xae   : > { %432 = shalt.err (!%p429_p3)
}
  0xaf   : > { %s469_s10 = smov 64   ;;  %s470_s11 = smov 4  }
  0xb0   : > { %364 = dma.vmem_to_hbm [thread:$0]  (%p529_p5), %s252_s28, 128, %s254_s29, %s239_s16, %s469_s10, %s469_s10, %s470_s11  }
  0xb1 PF: > { %p370_p4 = scmp.ge.s32.totalorder %s467_s15, 2  ;;  %s268_s17 = sand.u32 1, %s455_s12  }
  0xb2   : > { %s269_s19 = scalar_lea.sflag [#allocation3], %s268_s17 }
  0xb3   : > { %p367_p7 = pnand %p370_p4, %p533_p6 }
  0xb5   : > { %p368_p8 = pneg %p367_p7 }
  0xb7   : > { %450 = dma.done.wait (%p368_p8), %s269_s19, 128  }
  0xb8   : > { %452 = vsyncadd (%p368_p8), %s269_s19, 4294967168  ;;  %p13_p9 = scmp.ge.s32.totalorder %s516_s18, 4   ;;  %s599_s12 = smov %s459_s13 }
  0xb9   : > { %s600_s13 = smov %s463_s14  ;;  %s601_s14 = smov %s527_s21 }
  0xba   : > { %s602_s15 = smov %s516_s18  ;;  %15 = sbr.rel (!%p13_p9) target bundleno = 3 (0x3), region = 67 }
  0xbf   :  { %275 = vsyncpa [#allocation3], 1 }
  0xc0   :  { %277 = vsyncpa [#allocation3 + $0x1], 1 }

</bundles_post_ra>
